<compile_context>
chip_gen: v5e
topology: v5e:2x2
jax: 0.10.0
libtpu: 0.0.40
codegen_flags: <defaults>
</compile_context>

<pallas_src>
import functools

import jax
import jax.numpy as jnp
from jax.experimental import pallas as pl
from jax.experimental.pallas import tpu as pltpu

LANES = 128      # vreg lane width
SUBLANES = 8     # vreg sublane count (f32)
ROW_ALIGN = 16   # keep row tiles bf16-friendly ((16,128) bf16 tiles)
TM_MAX = 4096    # rows per block -> (4096,128) f32 = 2 MiB per input block
CHUNK = 512      # rows per inner-loop chunk (bounds elementwise temporaries)


def _num_tensorcores():
    """2 on v7x (2 TensorCores/chip); 1 on single-TC v5e/v6e (and fallback)."""
    try:
        kind = jax.devices()[0].device_kind.lower()
    except Exception:  # defensive only
        return 1
    return 2 if ("v7" in kind or "7x" in kind) else 1


def _round_up(x, m):
    return ((x + m - 1) // m) * m


def _bce_kernel(pred_ref, targ_ref, out_ref, *, rows, tm, chunk, bpc):
    """Accumulates sum(weighted_target * log(pred)) into out_ref's (c) block."""
    c = pl.program_id(0)   # core / partial-sum index ("parallel")
    i = pl.program_id(1)   # reduction step within this core ("arbitrary")

    @pl.when(i == 0)
    def _init():
        out_ref[...] = jnp.zeros_like(out_ref)

    start_row = (c * bpc + i) * tm
    remaining = rows - start_row          # rows of this block with real data
    nchunks = tm // chunk                 # static Python int

    def _chunk_sum(p, t):
        # loss * weight == -(t * w) * log(p); the leading minus is applied to
        # the final scalar in the wrapper (saves one VALU op per element).
        tw = jnp.where(t >= jnp.float32(0.5), t * jnp.float32(3.0), t)
        contrib = tw * jnp.log(p)                                # (chunk, 128)
        # Lane-parallel reduction: only the row-group axis is reduced here
        # (pure VPU adds); the cross-lane reduction happens once, outside.
        return jnp.sum(contrib.reshape(chunk // SUBLANES, SUBLANES, LANES),
                       axis=0)

    @pl.when(remaining >= tm)
    def _interior_block():                # fast path: no masking at all
        def body(k, acc):
            off = pl.multiple_of(k * chunk, chunk)
            p = pred_ref[pl.ds(off, chunk), :].astype(jnp.float32)
            t = targ_ref[pl.ds(off, chunk), :].astype(jnp.float32)
            return acc + _chunk_sum(p, t)

        acc = jax.lax.fori_loop(0, nchunks, body,
                                jnp.zeros((SUBLANES, LANES), jnp.float32),
                                unroll=True)
        out_ref[...] += acc[None, :, :]

    @pl.when(jnp.logical_and(remaining > 0, remaining < tm))
    def _ragged_block():                  # final partial block: row-masked
        def body(k, acc):
            off = pl.multiple_of(k * chunk, chunk)
            row_ids = off + jax.lax.broadcasted_iota(
                jnp.int32, (chunk, LANES), 0)
            valid = row_ids < remaining
            # Padded rows are selected to pred=1 / target=0 -> contribute
            # exactly 0 and no NaN/inf can leak from stale VMEM data.
            p = jnp.where(valid,
                          pred_ref[pl.ds(off, chunk), :].astype(jnp.float32),
                          jnp.float32(1.0))
            t = jnp.where(valid,
                          targ_ref[pl.ds(off, chunk), :].astype(jnp.float32),
                          jnp.float32(0.0))
            return acc + _chunk_sum(p, t)

        acc = jax.lax.fori_loop(0, nchunks, body,
                                jnp.zeros((SUBLANES, LANES), jnp.float32),
                                unroll=True)
        out_ref[...] += acc[None, :, :]

    # remaining <= 0 (fully out-of-range duplicate block on a 2-TC split):
    # only the (unavoidable, clamped) DMA is wasted -- no compute runs.


def _jax_loss_sum(pred, target):
    """Plain-JAX weighted-BCE sum (used only for tiny <128-element tails)."""
    p = pred.astype(jnp.float32)
    t = target.astype(jnp.float32)
    w = jnp.where(t >= 0.5, jnp.float32(3.0), jnp.float32(1.0))
    return jnp.sum(-t * jnp.log(p) * w)


def bce_loss(pred, target, size_average=True):
    assert pred.shape == target.shape
    n = pred.size

    pred_f = pred.reshape(-1)
    targ_f = target.reshape(-1)

    total = jnp.float32(0.0)

    rem = n % LANES
    if rem:
        # <128-element lane tail: handled in plain JAX.  NOTE: the prefix
        # slice below copies the aligned part once -- unavoidable when viewing
        # an unaligned buffer as a lane-dense 2-D slab (no full padded concat).
        total = total + _jax_loss_sum(pred_f[n - rem:], targ_f[n - rem:])
        pred_f = pred_f[:n - rem]
        targ_f = targ_f[:n - rem]

    rows = (n - rem) // LANES
    if rows == 0:
        total_all = total                 # degenerate tiny input: all in JAX
    else:
        pred_2d = pred_f.reshape(rows, LANES)   # zero-copy (bitcast) reshape
        targ_2d = targ_f.reshape(rows, LANES)

        ncores = _num_tensorcores()
        per_core = pl.cdiv(rows, ncores)
        tm = min(TM_MAX, _round_up(per_core, ROW_ALIGN))
        if tm >= CHUNK:
            tm = _round_up(tm, CHUNK)     # TM_MAX is a multiple of CHUNK
            chunk = CHUNK
        else:
            chunk = tm                    # single chunk per block

        nblocks = pl.cdiv(rows, tm)
        bpc = pl.cdiv(nblocks, ncores)    # reduction steps per core

        if ncores * bpc > nblocks:
            # Some (core, step) pairs point past the last real block: clamp
            # the DMA to the last block; the kernel skips their compute.
            def in_idx(c, i):
                return (jnp.minimum(c * bpc + i, nblocks - 1), 0)
        else:
            def in_idx(c, i):
                return (c * bpc + i, 0)

        kernel = functools.partial(_bce_kernel, rows=rows, tm=tm,
                                   chunk=chunk, bpc=bpc)

        partials = pl.pallas_call(
            kernel,
            out_shape=jax.ShapeDtypeStruct((ncores, SUBLANES, LANES),
                                           jnp.float32),
            grid_spec=pltpu.PrefetchScalarGridSpec(
                num_scalar_prefetch=0,
                grid=(ncores, bpc),
                in_specs=[
                    pl.BlockSpec((tm, LANES), in_idx),
                    pl.BlockSpec((tm, LANES), in_idx),
                ],
                out_specs=pl.BlockSpec((1, SUBLANES, LANES),
                                       lambda c, i: (c, 0, 0)),
            ),
            compiler_params=pltpu.CompilerParams(
                dimension_semantics=("parallel", "arbitrary"),
                vmem_limit_bytes=32 * 1024 * 1024),
        )(pred_2d, targ_2d)

        # Kernel accumulated sum(t*w*log(p)); apply the single negation here.
        total_all = total - jnp.sum(partials)

    if size_average:
        return total_all / jnp.float32(n)
    return total_all


def _reference(pred, target, size_average=True):
    p = pred.astype(jnp.float32)
    t = target.astype(jnp.float32)
    loss = -t * jnp.log(p)
    w = jnp.where(t >= 0.5, 3.0, 1.0)
    loss = loss * w
    return loss.mean() if size_average else loss.sum()


if __name__ == "__main__":
    key = jax.random.PRNGKey(0)
    k1, k2, k3, k4 = jax.random.split(key, 4)

    # Small NCHW-shaped inputs consistent with a segmentation-style BCE loss.
    shape = (2, 4, 16, 16)          # 2048 elements -> lane-aligned fast path
    # pred in (eps, 1-eps) so log() is finite; target in [0, 1].
    pred = jax.random.uniform(k1, shape, jnp.float32,
                              minval=1e-3, maxval=1.0 - 1e-3)
    target = jax.random.uniform(k2, shape, jnp.float32,
                                minval=0.0, maxval=1.0)

    out = jax.block_until_ready(bce_loss(pred, target, size_average=True))
    ref = _reference(pred, target, size_average=True)
    assert jnp.allclose(out, ref, rtol=1e-5, atol=1e-5), (out, ref)

    out_sum = jax.block_until_ready(bce_loss(pred, target, size_average=False))
    ref_sum = _reference(pred, target, size_average=False)
    assert jnp.allclose(out_sum, ref_sum, rtol=1e-4, atol=1e-4), (out_sum, ref_sum)

    # Unaligned total: exercises the ragged (masked) block + plain-JAX tail.
    shape2 = (3, 5, 7, 11)          # 1155 elements = 9*128 + 3
    pred2 = jax.random.uniform(k3, shape2, jnp.float32,
                               minval=1e-3, maxval=1.0 - 1e-3)
    target2 = jax.random.uniform(k4, shape2, jnp.float32,
                                 minval=0.0, maxval=1.0)
    out2 = jax.block_until_ready(bce_loss(pred2, target2, size_average=True))
    ref2 = _reference(pred2, target2, size_average=True)
    assert jnp.allclose(out2, ref2, rtol=1e-5, atol=1e-5), (out2, ref2)

    print("KERNEL_OK")
</pallas_src>

<mosaic_0001>
module attributes {stable_mosaic.version = 11 : i64} {
  func.func @_bce_kernel(%arg0: i32, %arg1: i32, %arg2: memref<16x128xf32, #tpu.memory_space<vmem>>, %arg3: memref<16x128xf32, #tpu.memory_space<vmem>>, %arg4: memref<1x8x128xf32, #tpu.memory_space<vmem>>) attributes {dimension_semantics = [#tpu.dimension_semantics<parallel>, #tpu.dimension_semantics<arbitrary>], iteration_bounds = array<i64: 1, 1>, scalar_prefetch = 0 : i64, scratch_operands = 0 : i64, tpu.core_type = #tpu.core_type<tc>, window_params = [{transform_indices = @transform_0, window_bounds = array<i64: 16, 128>}, {transform_indices = @transform_1, window_bounds = array<i64: 16, 128>}, {transform_indices = @transform_2, window_bounds = array<i64: 1, 8, 128>}]} {
    %c0_i32 = arith.constant 0 : i32
    %0 = arith.cmpi eq, %arg1, %c0_i32 : i32
    %1 = arith.extui %0 : i1 to i32
    %c0_i32_0 = arith.constant 0 : i32
    %2 = arith.cmpi ne, %1, %c0_i32_0 : i32
    scf.if %2 {
      %cst = arith.constant 0.000000e+00 : f32
      %15 = vector.broadcast %cst : f32 to vector<1x8x128xf32>
      %c0 = arith.constant 0 : index
      %c0_7 = arith.constant 0 : index
      %c0_8 = arith.constant 0 : index
      %16 = vector.load %arg4[%c0, %c0_7, %c0_8] : memref<1x8x128xf32, #tpu.memory_space<vmem>>, vector<1x8x128xf32>
      tpu.vector_store %arg4[%c0, %c0_7, %c0_8], %15 {strides = array<i32>} : memref<1x8x128xf32, #tpu.memory_space<vmem>>, vector<1x8x128xf32>,
    } else {
    }
    %c1_i32 = arith.constant 1 : i32
    %3 = arith.muli %arg0, %c1_i32 : i32
    %4 = arith.addi %3, %arg1 : i32
    %c16_i32 = arith.constant 16 : i32
    %5 = arith.muli %4, %c16_i32 : i32
    %c16_i32_1 = arith.constant 16 : i32
    %6 = arith.subi %c16_i32_1, %5 : i32
    %c16_i32_2 = arith.constant 16 : i32
    %7 = arith.cmpi sge, %6, %c16_i32_2 : i32
    %8 = arith.extui %7 : i1 to i32
    %c0_i32_3 = arith.constant 0 : i32
    %9 = arith.cmpi ne, %8, %c0_i32_3 : i32
    scf.if %9 {
      %cst = arith.constant 0.000000e+00 : f32
      %15 = vector.broadcast %cst : f32 to vector<8x128xf32>
      %c0_i32_7 = arith.constant 0 : i32
      %c16_i32_8 = arith.constant 16 : i32
      %16 = arith.muli %c0_i32_7, %c16_i32_8 : i32
      %17 = tpu.assume_multiple %16, 16 : i32
      %18 = arith.index_cast %17 : i32 to index
      %c0 = arith.constant 0 : index
      %19 = vector.load %arg2[%18, %c0] : memref<16x128xf32, #tpu.memory_space<vmem>>, vector<16x128xf32>
      %20 = arith.index_cast %17 : i32 to index
      %c0_9 = arith.constant 0 : index
      %21 = vector.load %arg3[%20, %c0_9] : memref<16x128xf32, #tpu.memory_space<vmem>>, vector<16x128xf32>
      %cst_10 = arith.constant 5.000000e-01 : f32
      %22 = vector.broadcast %cst_10 : f32 to vector<16x128xf32>
      %23 = arith.cmpf oge, %21, %22 : vector<16x128xf32>
      %cst_11 = arith.constant 3.000000e+00 : f32
      %24 = vector.broadcast %cst_11 : f32 to vector<16x128xf32>
      %25 = arith.mulf %21, %24 : vector<16x128xf32>
      %26 = arith.select %23, %25, %21 : vector<16x128xi1>, vector<16x128xf32>
      %27 = math.log %19 : vector<16x128xf32>
      %28 = arith.mulf %26, %27 : vector<16x128xf32>
      %29 = vector.shape_cast %28 : vector<16x128xf32> to vector<2x8x128xf32>
      %cst_12 = arith.constant dense<0.000000e+00> : vector<8x128xf32>
      %30 = vector.multi_reduction <add>, %29, %cst_12 [0] : vector<2x8x128xf32> to vector<8x128xf32>
      %31 = arith.addf %15, %30 : vector<8x128xf32>
      %c1_i32_13 = arith.constant 1 : i32
      %c0_14 = arith.constant 0 : index
      %c0_15 = arith.constant 0 : index
      %c0_16 = arith.constant 0 : index
      %32 = vector.load %arg4[%c0_14, %c0_15, %c0_16] : memref<1x8x128xf32, #tpu.memory_space<vmem>>, vector<1x8x128xf32>
      %33 = vector.shape_cast %31 : vector<8x128xf32> to vector<1x8x128xf32>
      %34 = arith.addf %32, %33 : vector<1x8x128xf32>
      %c0_17 = arith.constant 0 : index
      %c0_18 = arith.constant 0 : index
      %c0_19 = arith.constant 0 : index
      %35 = vector.load %arg4[%c0_17, %c0_18, %c0_19] : memref<1x8x128xf32, #tpu.memory_space<vmem>>, vector<1x8x128xf32>
      tpu.vector_store %arg4[%c0_17, %c0_18, %c0_19], %34 {strides = array<i32>} : memref<1x8x128xf32, #tpu.memory_space<vmem>>, vector<1x8x128xf32>,
    } else {
    }
    %c0_i32_4 = arith.constant 0 : i32
    %10 = arith.cmpi sgt, %6, %c0_i32_4 : i32
    %c16_i32_5 = arith.constant 16 : i32
    %11 = arith.cmpi slt, %6, %c16_i32_5 : i32
    %12 = arith.andi %10, %11 : i1
    %13 = arith.extui %12 : i1 to i32
    %c0_i32_6 = arith.constant 0 : i32
    %14 = arith.cmpi ne, %13, %c0_i32_6 : i32
    scf.if %14 {
      %cst = arith.constant 0.000000e+00 : f32
      %15 = vector.broadcast %cst : f32 to vector<8x128xf32>
      %c0_i32_7 = arith.constant 0 : i32
      %c16_i32_8 = arith.constant 16 : i32
      %16 = arith.muli %c0_i32_7, %c16_i32_8 : i32
      %17 = tpu.assume_multiple %16, 16 : i32
      %18 = tpu.iota {dimensions = array<i32: 0>} : vector<16x128xi32>
      %19 = vector.broadcast %17 : i32 to vector<16x128xi32>
      %20 = arith.addi %19, %18 : vector<16x128xi32>
      %21 = vector.broadcast %6 : i32 to vector<16x128xi32>
      %22 = arith.cmpi slt, %20, %21 : vector<16x128xi32>
      %23 = arith.index_cast %17 : i32 to index
      %c0 = arith.constant 0 : index
      %24 = vector.load %arg2[%23, %c0] : memref<16x128xf32, #tpu.memory_space<vmem>>, vector<16x128xf32>
      %cst_9 = arith.constant 1.000000e+00 : f32
      %25 = vector.broadcast %cst_9 : f32 to vector<16x128xf32>
      %26 = arith.select %22, %24, %25 : vector<16x128xi1>, vector<16x128xf32>
      %27 = arith.index_cast %17 : i32 to index
      %c0_10 = arith.constant 0 : index
      %28 = vector.load %arg3[%27, %c0_10] : memref<16x128xf32, #tpu.memory_space<vmem>>, vector<16x128xf32>
      %cst_11 = arith.constant 0.000000e+00 : f32
      %29 = vector.broadcast %cst_11 : f32 to vector<16x128xf32>
      %30 = arith.select %22, %28, %29 : vector<16x128xi1>, vector<16x128xf32>
      %cst_12 = arith.constant 5.000000e-01 : f32
      %31 = vector.broadcast %cst_12 : f32 to vector<16x128xf32>
      %32 = arith.cmpf oge, %30, %31 : vector<16x128xf32>
      %cst_13 = arith.constant 3.000000e+00 : f32
      %33 = vector.broadcast %cst_13 : f32 to vector<16x128xf32>
      %34 = arith.mulf %30, %33 : vector<16x128xf32>
      %35 = arith.select %32, %34, %30 : vector<16x128xi1>, vector<16x128xf32>
      %36 = math.log %26 : vector<16x128xf32>
      %37 = arith.mulf %35, %36 : vector<16x128xf32>
      %38 = vector.shape_cast %37 : vector<16x128xf32> to vector<2x8x128xf32>
      %cst_14 = arith.constant dense<0.000000e+00> : vector<8x128xf32>
      %39 = vector.multi_reduction <add>, %38, %cst_14 [0] : vector<2x8x128xf32> to vector<8x128xf32>
      %40 = arith.addf %15, %39 : vector<8x128xf32>
      %c1_i32_15 = arith.constant 1 : i32
      %c0_16 = arith.constant 0 : index
      %c0_17 = arith.constant 0 : index
      %c0_18 = arith.constant 0 : index
      %41 = vector.load %arg4[%c0_16, %c0_17, %c0_18] : memref<1x8x128xf32, #tpu.memory_space<vmem>>, vector<1x8x128xf32>
      %42 = vector.shape_cast %40 : vector<8x128xf32> to vector<1x8x128xf32>
      %43 = arith.addf %41, %42 : vector<1x8x128xf32>
      %c0_19 = arith.constant 0 : index
      %c0_20 = arith.constant 0 : index
      %c0_21 = arith.constant 0 : index
      %44 = vector.load %arg4[%c0_19, %c0_20, %c0_21] : memref<1x8x128xf32, #tpu.memory_space<vmem>>, vector<1x8x128xf32>
      tpu.vector_store %arg4[%c0_19, %c0_20, %c0_21], %43 {strides = array<i32>} : memref<1x8x128xf32, #tpu.memory_space<vmem>>, vector<1x8x128xf32>,
    } else {
    }
    return
  }
  func.func @transform_0(%arg0: i32, %arg1: i32) -> (i32, i32) {
    %c1_i32 = arith.constant 1 : i32
    %0 = arith.muli %arg0, %c1_i32 : i32
    %1 = arith.addi %0, %arg1 : i32
    %c0_i32 = arith.constant 0 : i32
    %c0_i32_0 = arith.constant 0 : i32
    return %1, %c0_i32 : i32, i32
  }
  func.func @transform_1(%arg0: i32, %arg1: i32) -> (i32, i32) {
    %c1_i32 = arith.constant 1 : i32
    %0 = arith.muli %arg0, %c1_i32 : i32
    %1 = arith.addi %0, %arg1 : i32
    %c0_i32 = arith.constant 0 : i32
    %c0_i32_0 = arith.constant 0 : i32
    return %1, %c0_i32 : i32, i32
  }
  func.func @transform_2(%arg0: i32, %arg1: i32) -> (i32, i32, i32) {
    %c0_i32 = arith.constant 0 : i32
    %c0_i32_0 = arith.constant 0 : i32
    %c0_i32_1 = arith.constant 0 : i32
    return %arg0, %c0_i32, %c0_i32_0 : i32, i32, i32
  }
}

</mosaic_0001>

<bundles_post_ra>
// kernel: tpu_custom_call.1
= control target key start
LH: loop header
LB: loop body
LE: loop exit
PB: predicated region body
PF: predicated region fallthrough
CT: control target
= control target key end

     0   :  { %7 = vsyncpa [#allocation3], 0  ;;  %s264_s0 = inlined_call_operand.hbm [shape: f32[16,128], index: 0, kind: input, shape index: {}]   ;;  %s265_s1 = inlined_call_operand.hbm [shape: f32[16,128], index: 1, kind: input, shape index: {}]   ;;  %s266_s2 = inlined_call_operand.hbm [shape: f32[1,8,128], index: 2, kind: output, shape index: {}]  }
   0x1   :  { %8 = vsyncpa [#allocation6], 0 }
   0x2   :  { %9 = vsyncpa [#allocation4], 0  ;;  %s18_s11 = sshll.u32 %s264_s0, 4  ;;  %s235_s12 = smov [#allocation2]   ;;  %s19_s11 = int_to_ptr.hbm [resolvable:$true] %s18_s11 }
   0x3   :  { %s20_s13 = sshll.u32 %s235_s12, 4  ;;  %s35_s16 = sshll.u32 %s265_s1, 4  ;;  %s21_s13 = int_to_ptr.vmem [resolvable:$true] %s20_s13  ;;  %s36_s16 = int_to_ptr.hbm [resolvable:$true] %s35_s16 }
   0x4   :  { %s236_s17 = smov 128   ;;  %s237_s18 = smov 8  }
   0x5   :  { %26 = dma.hbm_to_vmem [thread:$0]  %s19_s11, 256, %s21_s13, [#allocation3], %s236_s17, %s236_s17, %s237_s18  }
   0x6   :  { %s238_s19 = smov [#allocation5]  }
   0x7   :  { %s37_s20 = sshll.u32 %s238_s19, 4  ;;  %s38_s20 = int_to_ptr.vmem [resolvable:$true] %s37_s20 }
   0x8   :  { %43 = dma.hbm_to_vmem [thread:$0]  %s36_s16, 256, %s38_s20, [#allocation6], %s236_s17, %s236_s17, %s237_s18  }
   0x9   :  { %229 = dma.done.wait [#allocation3], 256  }
   0xa   :  { %230 = vsyncadd [#allocation3], 4294967040 }
   0xb   :  { %231 = dma.done.wait [#allocation6], 256  }
   0xc   :  { %232 = vsyncadd [#allocation6], 4294967040  ;;  %v68_v0 = vld [vmem:[#allocation2] sm:$0xff]  ;;  %v69_v1 = vld [vmem:[#allocation2 + $0x8] sm:$0xff]  ;;  %s239_s0 = smov [#allocation7]   ;;  %s136_s23 = sshll.u32 %s266_s2, 4  ;;  %s137_s23 = int_to_ptr.hbm [resolvable:$true] %s136_s23 }
   0xd   :  { %v70_v2 = vld [vmem:[#allocation5] sm:$0xff]  ;;  %v71_v3 = vld [vmem:[#allocation5 + $0x8] sm:$0xff]  ;;  %153 = vlog2.f32 %v68_v0  ;;  %s134_s1 = sshll.u32 %s239_s0, 4  ;;  %s135_s1 = int_to_ptr.vmem [resolvable:$true] %s134_s1 }
   0xe   :  { %155 = vlog2.f32 %v69_v1  ;;  %v74_v4 = vmul.f32 3.0, %v70_v2  ;;  %vm72_vm0 = vcmp.ge.f32.partialorder %v70_v2, 0.5  ;;  %v75_v5 = vmul.f32 3.0, %v71_v3 }
   0xf   :  { %vm73_vm1 = vcmp.ge.f32.partialorder %v71_v3, 0.5 }
  0x10   :  { %v76_v7 = vsel %vm72_vm0, %v74_v4, %v70_v2  ;;  %v77_v9 = vsel %vm73_vm1, %v75_v5, %v71_v3 }
  0x13   :  { %v154_v6 = vpop.eup %153 }
  0x14   :  { %v156_v8 = vpop.eup %155  ;;  %v79_v10 = vmul.f32 0.6931472, %v154_v6 }
  0x15   :  { %v81_v11 = vmul.f32 0.6931472, %v156_v8 }
  0x16   :  { %v82_v12 = vmul.f32 %v79_v10, %v76_v7 }
  0x17   :  { %v83_v13 = vmul.f32 %v81_v11, %v77_v9 }
  0x19   :  { %v84_v14 = vadd.f32 %v83_v13, %v82_v12 }
  0x1b   :  { %88 = vst [vmem:[#allocation7] sm:$0xff] %v84_v14 }
  0x1c   :  { %139 = dma.vmem_to_hbm [thread:$0]  %s135_s1, 128, %s137_s23, [#allocation4]  }
  0x1d   :  { %233 = dma.done.wait [#allocation4], 128  }
  0x1e   :  { %234 = vsyncadd [#allocation4], 4294967168 }
  0x1f   :  { %144 = vsyncpa [#allocation3], 1 }
  0x20   :  { %145 = vsyncpa [#allocation6], 1 }
  0x21   :  { %146 = vsyncpa [#allocation4], 1 }

</bundles_post_ra>
